<compile_context>
chip_gen: v7x
topology: tpu7x:2x2x1
jax: 0.10.0
libtpu: 0.0.40
codegen_flags: <defaults>
</compile_context>

<pallas_src>
import numpy as np
import jax
import jax.numpy as jnp
from jax.experimental import pallas as pl
from jax.experimental.pallas import tpu as pltpu

_EPS = 1e-12  # matches torch.nn.functional.normalize default eps


def _round_up(x, m):
    return (x + m - 1) // m * m


def _pick_tile(n, align, cap=512):
    """Largest tile <= cap (multiple of `align`) minimizing padding of n."""
    n_al = _round_up(n, align)
    if n_al <= cap:
        return n_al
    best_t, best_pad = align, None
    t = cap
    while t >= align:
        pad = _round_up(n_al, t) - n_al
        if best_pad is None or pad < best_pad:
            best_t, best_pad = t, pad
        if pad == 0:
            break
        t -= align
    return best_t


def _sieve_jointer_kernel(src_ref, sieve_ref, tar_ref, out_ref):
    """out = relu(normalize(src * sieve) @ normalize(tar)^T) for one (b, i, j) tile."""
    src = src_ref[0]      # (tn, d_pad) f32
    sieve = sieve_ref[0]  # (tn, d_pad) f32
    tar = tar_ref[0]      # (tm, d_pad) f32

    # normalize(src * normalize(sieve)) == normalize(src * sieve): the positive
    # per-row sieve scale cancels under the outer row normalization.
    x = src * sieve
    x_n = x * jax.lax.rsqrt(
        jnp.maximum(jnp.sum(x * x, axis=-1, keepdims=True), _EPS * _EPS))
    t_n = tar * jax.lax.rsqrt(
        jnp.maximum(jnp.sum(tar * tar, axis=-1, keepdims=True), _EPS * _EPS))

    # bf16 MXU inputs, f32 accumulation.  Contracting dims (1, 1) == A @ B^T
    # (no explicit transpose materialized).
    scores = jax.lax.dot_general(
        x_n.astype(jnp.bfloat16), t_n.astype(jnp.bfloat16),
        dimension_numbers=(((1,), (1,)), ((), ())),
        preferred_element_type=jnp.float32)

    out_ref[0] = jnp.maximum(scores, 0.0)


@jax.jit
def _sieve_jointer_scores(source, target, sieve):
    """Batched (B, N, M) relu-cosine scores via a single pallas_call."""
    B, N, D = source.shape
    M = target.shape[1]

    d_pad = _round_up(D, 128)
    tn = _pick_tile(N, 8, cap=512)      # row tile (sublane-aligned)
    tm = _pick_tile(M, 128, cap=512)    # col tile (lane-dense output stores)
    n_pad = _round_up(N, tn)
    m_pad = _round_up(M, tm)

    src = jnp.pad(source, ((0, 0), (0, n_pad - N), (0, d_pad - D)))
    siv = jnp.pad(sieve, ((0, 0), (0, n_pad - N), (0, d_pad - D)))
    tar = jnp.pad(target, ((0, 0), (0, m_pad - M), (0, d_pad - D)))

    grid = (B, n_pad // tn, m_pad // tm)
    scores = pl.pallas_call(
        _sieve_jointer_kernel,
        out_shape=jax.ShapeDtypeStruct((B, n_pad, m_pad), jnp.float32),
        grid_spec=pltpu.PrefetchScalarGridSpec(
            num_scalar_prefetch=0,
            grid=grid,
            in_specs=[
                pl.BlockSpec((1, tn, d_pad), lambda b, i, j: (b, i, 0)),
                pl.BlockSpec((1, tn, d_pad), lambda b, i, j: (b, i, 0)),
                pl.BlockSpec((1, tm, d_pad), lambda b, i, j: (b, j, 0)),
            ],
            out_specs=pl.BlockSpec((1, tn, tm), lambda b, i, j: (b, i, j)),
        ),
        compiler_params=pltpu.CompilerParams(
            dimension_semantics=("parallel", "parallel", "parallel"),
            vmem_limit_bytes=32 * 1024 * 1024,
        ),
    )(src, siv, tar)

    return scores[:, :N, :M]


class SieveJointer:
    """JAX/Pallas port of the PyTorch SieveJointer module (no learned params)."""

    def __init__(self, d_model, triu_mask=False):
        self.d_model = d_model
        self.use_triu_mask = bool(triu_mask)

    def __call__(self, source, target, sieve, mask_src, mask_tar):
        source = jnp.asarray(source, dtype=jnp.float32)
        target = jnp.asarray(target, dtype=jnp.float32)
        sieve = jnp.asarray(sieve, dtype=jnp.float32)
        assert source.shape[-1] == self.d_model

        # One batched kernel launch; padded/masked rows are computed but cheap.
        scores = _sieve_jointer_scores(source, target, sieve)     # (B, N, M)
        scores_np = np.asarray(scores)                            # single device->host sync

        mask_src = np.asarray(mask_src).astype(bool)
        mask_tar = np.asarray(mask_tar).astype(bool)

        # TODO(synk): ragged masked_select / triu gather has data-dependent
        # output shapes, so it stays on host (numpy) after the single copy.
        results = []
        for i in range(scores_np.shape[0]):
            sub = scores_np[i][mask_src[i]][:, mask_tar[i]]       # (n_i, m_i), packed order
            if self.use_triu_mask:
                # torch: triu(ones(512,512)) == 0  <=>  strictly-lower triangle.
                # Built at the exact (n_i, m_i) size (also fixes the >512 hazard).
                tri = np.tri(sub.shape[0], sub.shape[1], k=-1, dtype=bool)
                result = sub[tri]
            else:
                result = sub.reshape(-1)
            results.append(jnp.asarray(result))
        return results


def _reference(source, target, sieve, mask_src, mask_tar, triu=False):
    """Pure numpy f32 reference mirroring the PyTorch forward pass."""
    def norm(x):
        return x / np.maximum(np.linalg.norm(x, axis=-1, keepdims=True), _EPS)

    source = np.asarray(source, np.float32)
    target = np.asarray(target, np.float32)
    sieve = np.asarray(sieve, np.float32)
    sieve_n = norm(sieve)
    src_n = norm(source * sieve_n)
    tar_n = norm(target)
    out = []
    for i in range(source.shape[0]):
        cs = src_n[i][np.asarray(mask_src[i]).astype(bool)]
        ct = tar_n[i][np.asarray(mask_tar[i]).astype(bool)]
        full = np.maximum(cs @ ct.T, 0.0)
        if triu:
            out.append(full[np.tri(full.shape[0], full.shape[1], k=-1, dtype=bool)])
        else:
            out.append(full.reshape(-1))
    return out


def _check(d_model, source, target, sieve, mask_src, mask_tar, atol):
    for triu in (False, True):
        jointer = SieveJointer(d_model=d_model, triu_mask=triu)
        results = jointer(source, target, sieve, mask_src, mask_tar)
        results = [jax.block_until_ready(r) for r in results]
        refs = _reference(source, target, sieve, mask_src, mask_tar, triu=triu)
        for got, want in zip(results, refs):
            assert got.shape == want.shape, (got.shape, want.shape)
            np.testing.assert_allclose(np.asarray(got), want, rtol=0, atol=atol)


if __name__ == "__main__":
    # bf16 MXU operands -> relaxed tolerance vs the f32 numpy reference.
    ATOL = 2e-2

    # --- Small shape (B=2, N=M=8, D=32), single tile per batch ---------------
    B, N, M, D = 2, 8, 8, 32
    key = jax.random.PRNGKey(0)
    k1, k2, k3 = jax.random.split(key, 3)
    source = jax.random.normal(k1, (B, N, D), dtype=jnp.float32)
    target = jax.random.normal(k2, (B, M, D), dtype=jnp.float32)
    sieve = jax.random.normal(k3, (B, N, D), dtype=jnp.float32)
    mask_src = jnp.array([[1, 1, 1, 0, 1, 0, 1, 1],
                          [1, 0, 1, 1, 1, 1, 0, 0]], dtype=bool)
    mask_tar = jnp.array([[1, 0, 1, 1, 0, 1, 1, 1],
                          [0, 1, 1, 1, 0, 1, 1, 0]], dtype=bool)
    _check(D, source, target, sieve, mask_src, mask_tar, ATOL)

    # --- Medium shape exercising a multi-tile grid (2x row, 2x col tiles) ----
    B2, N2, M2, D2 = 2, 640, 1024, 48
    k4, k5, k6 = jax.random.split(jax.random.PRNGKey(1), 3)
    source2 = jax.random.normal(k4, (B2, N2, D2), dtype=jnp.float32)
    target2 = jax.random.normal(k5, (B2, M2, D2), dtype=jnp.float32)
    sieve2 = jax.random.normal(k6, (B2, N2, D2), dtype=jnp.float32)
    mask_src2 = jnp.asarray((np.arange(B2 * N2).reshape(B2, N2) % 5) != 0)
    mask_tar2 = jnp.asarray((np.arange(B2 * M2).reshape(B2, M2) % 3) != 0)
    _check(D2, source2, target2, sieve2, mask_src2, mask_tar2, ATOL)

    print("KERNEL_OK")
</pallas_src>

<mosaic_0001>
module attributes {stable_mosaic.version = 11 : i64} {
  func.func @_sieve_jointer_kernel(%arg0: i32, %arg1: i32, %arg2: i32, %arg3: memref<1x8x128xf32, #tpu.memory_space<vmem>>, %arg4: memref<1x8x128xf32, #tpu.memory_space<vmem>>, %arg5: memref<1x128x128xf32, #tpu.memory_space<vmem>>, %arg6: memref<1x8x128xf32, #tpu.memory_space<vmem>>) attributes {dimension_semantics = [#tpu.dimension_semantics<parallel>, #tpu.dimension_semantics<parallel>, #tpu.dimension_semantics<parallel>], iteration_bounds = array<i64: 2, 1, 1>, scalar_prefetch = 0 : i64, scratch_operands = 0 : i64, tpu.core_type = #tpu.core_type<tc>, window_params = [{transform_indices = @transform_0, window_bounds = array<i64: 1, 8, 128>}, {transform_indices = @transform_1, window_bounds = array<i64: 1, 8, 128>}, {transform_indices = @transform_2, window_bounds = array<i64: 1, 128, 128>}, {transform_indices = @transform_3, window_bounds = array<i64: 1, 8, 128>}]} {
    %c0 = arith.constant 0 : index
    %c0_0 = arith.constant 0 : index
    %c0_1 = arith.constant 0 : index
    %0 = vector.load %arg3[%c0, %c0_0, %c0_1] : memref<1x8x128xf32, #tpu.memory_space<vmem>>, vector<1x8x128xf32>
    %1 = vector.shape_cast %0 : vector<1x8x128xf32> to vector<8x128xf32>
    %c0_2 = arith.constant 0 : index
    %c0_3 = arith.constant 0 : index
    %c0_4 = arith.constant 0 : index
    %2 = vector.load %arg4[%c0_2, %c0_3, %c0_4] : memref<1x8x128xf32, #tpu.memory_space<vmem>>, vector<1x8x128xf32>
    %3 = vector.shape_cast %2 : vector<1x8x128xf32> to vector<8x128xf32>
    %c0_5 = arith.constant 0 : index
    %c0_6 = arith.constant 0 : index
    %c0_7 = arith.constant 0 : index
    %4 = vector.load %arg5[%c0_5, %c0_6, %c0_7] : memref<1x128x128xf32, #tpu.memory_space<vmem>>, vector<1x128x128xf32>
    %5 = vector.shape_cast %4 : vector<1x128x128xf32> to vector<128x128xf32>
    %6 = arith.mulf %1, %3 : vector<8x128xf32>
    %7 = arith.mulf %6, %6 : vector<8x128xf32>
    %cst = arith.constant dense<0.000000e+00> : vector<8xf32>
    %8 = vector.multi_reduction <add>, %7, %cst [1] : vector<8x128xf32> to vector<8xf32>
    %9 = vector.shape_cast %8 : vector<8xf32> to vector<8x1xf32>
    %cst_8 = arith.constant 1.000000e-24 : f32
    %10 = vector.broadcast %cst_8 : f32 to vector<8x1xf32>
    %11 = arith.maximumf %9, %10 : vector<8x1xf32>
    %12 = math.rsqrt %11 : vector<8x1xf32>
    %13 = vector.broadcast %12 : vector<8x1xf32> to vector<8x128xf32>
    %14 = arith.mulf %6, %13 : vector<8x128xf32>
    %15 = arith.mulf %5, %5 : vector<128x128xf32>
    %cst_9 = arith.constant dense<0.000000e+00> : vector<128xf32>
    %16 = vector.multi_reduction <add>, %15, %cst_9 [1] : vector<128x128xf32> to vector<128xf32>
    %17 = vector.shape_cast %16 : vector<128xf32> to vector<128x1xf32>
    %cst_10 = arith.constant 1.000000e-24 : f32
    %18 = vector.broadcast %cst_10 : f32 to vector<128x1xf32>
    %19 = arith.maximumf %17, %18 : vector<128x1xf32>
    %20 = math.rsqrt %19 : vector<128x1xf32>
    %21 = vector.broadcast %20 : vector<128x1xf32> to vector<128x128xf32>
    %22 = arith.mulf %5, %21 : vector<128x128xf32>
    %23 = arith.truncf %14 : vector<8x128xf32> to vector<8x128xbf16>
    %24 = arith.truncf %22 : vector<128x128xf32> to vector<128x128xbf16>
    %cst_11 = arith.constant dense<0.000000e+00> : vector<8x128xf32>
    %25 = tpu.matmul %23, %24, %cst_11 {dimension_numbers = #tpu.dot_dimension_numbers<[1], [1], [0], [0], [0, 0, 1, 0], [], []>} : vector<8x128xbf16>, vector<128x128xbf16>, vector<8x128xf32> -> vector<8x128xf32>
    %cst_12 = arith.constant 0.000000e+00 : f32
    %26 = vector.broadcast %cst_12 : f32 to vector<8x128xf32>
    %27 = arith.maximumf %25, %26 : vector<8x128xf32>
    %c0_13 = arith.constant 0 : index
    %c0_14 = arith.constant 0 : index
    %c0_15 = arith.constant 0 : index
    %28 = vector.load %arg6[%c0_13, %c0_14, %c0_15] : memref<1x8x128xf32, #tpu.memory_space<vmem>>, vector<1x8x128xf32>
    %29 = vector.shape_cast %28 : vector<1x8x128xf32> to vector<8x128xf32>
    %30 = vector.shape_cast %27 : vector<8x128xf32> to vector<1x8x128xf32>
    tpu.vector_store %arg6[%c0_13, %c0_14, %c0_15], %30 {strides = array<i32>} : memref<1x8x128xf32, #tpu.memory_space<vmem>>, vector<1x8x128xf32>,
    return
  }
  func.func @transform_0(%arg0: i32, %arg1: i32, %arg2: i32) -> (i32, i32, i32) {
    %c0_i32 = arith.constant 0 : i32
    %c0_i32_0 = arith.constant 0 : i32
    return %arg0, %arg1, %c0_i32 : i32, i32, i32
  }
  func.func @transform_1(%arg0: i32, %arg1: i32, %arg2: i32) -> (i32, i32, i32) {
    %c0_i32 = arith.constant 0 : i32
    %c0_i32_0 = arith.constant 0 : i32
    return %arg0, %arg1, %c0_i32 : i32, i32, i32
  }
  func.func @transform_2(%arg0: i32, %arg1: i32, %arg2: i32) -> (i32, i32, i32) {
    %c0_i32 = arith.constant 0 : i32
    %c0_i32_0 = arith.constant 0 : i32
    return %arg0, %arg2, %c0_i32 : i32, i32, i32
  }
  func.func @transform_3(%arg0: i32, %arg1: i32, %arg2: i32) -> (i32, i32, i32) {
    %c0_i32 = arith.constant 0 : i32
    return %arg0, %arg1, %arg2 : i32, i32, i32
  }
}

</mosaic_0001>

<bundles_post_ra>
// kernel: _sieve_jointer_scores.1
= control target key start
LH: loop header
LB: loop body
LE: loop exit
PB: predicated region body
PF: predicated region fallthrough
CT: control target
= control target key end

     0   :  { %8 = vsyncpa [#allocation3], 0  ;;  %s1033_s0 = inlined_call_operand.vmem [shape: f32[2,8,128], index: 0, kind: input, shape index: {}]   ;;  %s1034_s1 = inlined_call_operand.vmem [shape: f32[2,8,128], index: 1, kind: input, shape index: {}]   ;;  %s1035_s2 = inlined_call_operand.vmem [shape: f32[2,128,128], index: 2, kind: input, shape index: {}]   ;;  %s1036_s3 = inlined_call_operand.hbm [shape: f32[2,8,128], index: 3, kind: output, shape index: {}]  }
   0x1   :  { %10 = vsyncpa [#allocation3 + $0x1], 0  ;;  %s799_s12 = smov 0   ;;  %s801_s13 = smov 0  }
   0x2   :  { %s803_s14 = smov 0   ;;  %s805_s15 = smov 0  }
   0x3   :  { %s807_s16 = smov 0   ;;  %s809_s17 = smov 0  }
   0x4 LB: > { %s561_s18 = sadd.s32 4294967295, %s774_s17   ;;  %s562_s19 = sadd.s32 4294967294, %s774_s17   ;;  %s774_s17 = sphi %s809_s17, %s16_s17   ;;  %s770_s16 = sphi %s807_s16, %s1043_s16   ;;  %s766_s15 = sphi %s805_s15, %s1042_s15   ;;  %s762_s14 = sphi %s803_s14, %s1041_s14   ;;  %s758_s13 = sphi %s801_s13, %s1040_s13   ;;  %s754_s12 = sphi %s799_s12, %s1039_s12  }
   0x5   : > { %s35_s20 = sadd.s32 1, %s770_s16  ;;  %s130_s21 = sadd.s32 1, %s762_s14 }
   0x6   : > { %p37_p0 = scmp.ge.s32.totalorder %s35_s20, 2  ;;  %p140_p1 = scmp.ne.s32.totalorder %s762_s14, %s758_s13 }
   0x7   : > { %p141_p2 = scmp.eq.s32.totalorder %s561_s18, 1  ;;  %p146_p3 = scmp.ne.s32.totalorder %s758_s13, %s754_s12 }
   0x8   : > { %s1045_s20 = smov (%p37_p0, %s35_s20), 0  ;;  %p147_p5 = scmp.eq.s32.totalorder %s562_s19, 1 }
   0x9   : > { %p839_p4 = por %p141_p2, %p140_p1  ;;  %s123_s23 = ssub.s32 %s770_s16, %s1045_s20 }
   0xa   : > { %p565_p6 = scmp.ge.s32.totalorder %s774_s17, 1  ;;  %p128_p7 = scmp.eq.s32.totalorder %s123_s23, 0 }
   0xb   : > { %p846_p8 = por %p147_p5, %p146_p3  ;;  %p198_p9 = scmp.lt.s32.totalorder %s774_s17, 3 }
   0xc   : > { %s852_s25 = scalar_select %p128_p7, %s762_s14, %s130_s21  }
   0xd   : > { %p199_p10 = pnand %p565_p6, %p198_p9 }
   0xe   : > { %p240_p11 = scmp.lt.s32.totalorder (!%p199_p10), %s766_s15, 1  ;;  %v776_v35 = vmov (!%p199_p10), 0.0   ;;  %vm777_vm0 = vmmov (!%p199_p10), 0   ;;  %s237_s11 = sand.u32 (!%p199_p10), 1, %s758_s13  }
   0xf   : > { %202 = sbr.rel (%p199_p10) target bundleno = 483 (0x1e3), region = 32  ;;  %585 = vmatprep.subr.bf16.mxu0 (!%p199_p10), %v776_v35  ;;  %601 = vmatprep.mubr.msk.bf16.mxu0 (!%p199_p10), %vm777_vm0, %v776_v35  ;;  %s566_s18 = sshll.u32 (!%p199_p10), %s237_s11, 3 }
  0x10   : > { %s572_s19 = sshll.u32 (!%p199_p10), %s766_s15, 7  ;;  %s239_s21 = scalar_lea.vmem (!%p199_p10), [#allocation2], %s566_s18 }
  0x11   : > { %s453_s23 = sshll.u32 (!%p199_p10), %s239_s21, 4  ;;  %s986_s28 = scalar_lea.hbm (!%p199_p10), %s1036_s3, %s572_s19  ;;  %s988_s23 = int_to_ptr.vmem [resolvable:$true] %s453_s23 }
  0x12   : > { %s438_s29 = scalar_lea.sflag (!%p199_p10), [#allocation3], %s237_s11 }
  0x16   : > { %s856_s26 = scalar_select %p240_p11, %s766_s15, 1 }
  0x17   : > { %s696_s15 = scalar_lea.vmem %s988_s23, 128 }
  0x18   : > { %s575_s27 = sshll.u32 %s856_s26, 7  ;;  %s567_s4 = sshll.u32 %s856_s26, 3 }
  0x19   : > { %s862_s30 = scalar_lea.vmem %s1035_s2, %s575_s27  ;;  %s246_s7 = scalar_lea.vmem %s1033_s0, %s567_s4 }
  0x1a   : > { %v865_v0 = vld [vmem:[%s862_s30] sm:$0xff]  ;;  %v868_v1 = vld [vmem:[%s862_s30 + $0x10] sm:$0xff]  ;;  %v871_v2 = vld [vmem:[%s862_s30 + $0x8] sm:$0xff]  ;;  %s253_s10 = scalar_lea.vmem %s1034_s1, %s567_s4  ;;  %p697_p12 = scmp.ne.s32.totalorder %s988_s23, %s696_s15 }
  0x1b   : > { %v290_v3 = vmul.f32 %v865_v0, %v865_v0  ;;  %v292_v4 = vmul.f32 %v868_v1, %v868_v1  ;;  %v878_v5 = vld [vmem:[%s862_s30 + $0x18] sm:$0xff]  ;;  %v291_v6 = vmul.f32 %v871_v2, %v871_v2  ;;  %v885_v8 = vld [vmem:[%s862_s30 + $0x28] sm:$0xff]  ;;  %v888_v9 = vld [vmem:[%s862_s30 + $0x20] sm:$0xff] }
  0x1c   : > { %v293_v7 = vmul.f32 %v878_v5, %v878_v5  ;;  %v295_v10 = vmul.f32 %v885_v8, %v885_v8  ;;  %v294_v11 = vmul.f32 %v888_v9, %v888_v9  ;;  %v895_v12 = vld [vmem:[%s862_s30 + $0x38] sm:$0xff]  ;;  %v898_v13 = vld [vmem:[%s862_s30 + $0x30] sm:$0xff]  ;;  %v905_v16 = vld [vmem:[%s862_s30 + $0x48] sm:$0xff]  ;;  %p698_p13 = pnand %p697_p12, %p839_p4 }
  0x1d   : > { %306 = vadd.xlane.f32.xlu0 %v290_v3  ;;  %310 = vadd.xlane.f32.xlu1 %v292_v4  ;;  %v297_v14 = vmul.f32 %v895_v12, %v895_v12  ;;  %v296_v15 = vmul.f32 %v898_v13, %v898_v13  ;;  %v908_v17 = vld [vmem:[%s862_s30 + $0x40] sm:$0xff]  ;;  %v299_v18 = vmul.f32 %v905_v16, %v905_v16  ;;  %v915_v20 = vld [vmem:[%s862_s30 + $0x58] sm:$0xff]  ;;  %v918_v21 = vld [vmem:[%s862_s30 + $0x50] sm:$0xff] }
  0x1e   : > { %v298_v19 = vmul.f32 %v908_v17, %v908_v17  ;;  %v301_v22 = vmul.f32 %v915_v20, %v915_v20  ;;  %v300_v23 = vmul.f32 %v918_v21, %v918_v21  ;;  %v926_v24 = vld [vmem:[%s862_s30 + $0x68] sm:$0xff]  ;;  %v929_v25 = vld [vmem:[%s862_s30 + $0x60] sm:$0xff]  ;;  %v942_v28 = vld [vmem:[%s862_s30 + $0x78] sm:$0xff]  ;;  %p699_p0 = pneg %p698_p13 }
  0x1f   : > { %v303_v26 = vmul.f32 %v926_v24, %v926_v24  ;;  %v302_v27 = vmul.f32 %v929_v25, %v929_v25  ;;  %v945_v29 = vld [vmem:[%s862_s30 + $0x70] sm:$0xff]  ;;  %v265_v30 = vld [vmem:[%s246_s7] sm:$0xff]  ;;  %v305_v32 = vmul.f32 %v942_v28, %v942_v28  ;;  %s778_s30 = smov [#allocation2]  }
  0x20   : > { %v266_v31 = vld [vmem:[%s253_s10] sm:$0xff]  ;;  %v304_v33 = vmul.f32 %v945_v29, %v945_v29  ;;  %s700_s4 = sshll.u32 %s778_s30, 4  ;;  %s701_s4 = int_to_ptr.vmem [resolvable:$false] %s700_s4 }
  0x21   : > { %308 = vadd.xlane.f32.xlu0 %v291_v6  ;;  %312 = vadd.xlane.f32.xlu1 %v293_v7  ;;  %v951_v34 = vmul.f32 %v266_v31, %v265_v30  ;;  %s702_s5 = scalar_lea.vmem %s701_s4, 256  ;;  %p703_p1 = scmp.lt.s32.totalorder %s988_s23, %s701_s4 }
  0x22   : > { %p704_p2 = scmp.lt.s32.totalorder %s702_s5, %s696_s15 }
  0x23   : > { %v284_v36 = vmul.f32 %v951_v34, %v951_v34 }
  0x24   : > { %p705_p3 = por %p704_p2, %p703_p1 }
  0x25   : > { %316 = vadd.xlane.f32.xlu1 %v295_v10  ;;  %314 = vadd.xlane.f32.xlu0 %v294_v11 }
  0x26   : > { %p706_p5 = pnand %p705_p3, %p699_p0 }
  0x29   : > { %320 = vadd.xlane.f32.xlu1 %v297_v14  ;;  %318 = vadd.xlane.f32.xlu0 %v296_v15 }
  0x2d   : > { %324 = vadd.xlane.f32.xlu1 %v299_v18  ;;  %322 = vadd.xlane.f32.xlu0 %v298_v19 }
  0x31   : > { %328 = vadd.xlane.f32.xlu1 %v301_v22  ;;  %326 = vadd.xlane.f32.xlu0 %v300_v23 }
  0x35   : > { %332 = vadd.xlane.f32.xlu1 %v303_v26  ;;  %330 = vadd.xlane.f32.xlu0 %v302_v27 }
  0x39   : > { %336 = vadd.xlane.f32.xlu1 %v305_v32  ;;  %334 = vadd.xlane.f32.xlu0 %v304_v33 }
  0x3d   : > { %285 = vadd.xlane.f32.xlu0 %v284_v36 }
  0xaa   : > { %v307_v37 = vpop.xlane.xlu0 %306  ;;  %v311_v38 = vpop.xlane.xlu1 %310 }
  0xab   : > { %v338_v39 = vmax.f32 %v307_v37, 1e-24  ;;  %v340_v43 = vmax.f32 %v311_v38, 1e-24 }
  0xad   : > { %662 = vrsqrt.f32 %v338_v39 }
  0xae   : > { %v309_v40 = vpop.xlane.xlu0 %308  ;;  %v313_v41 = vpop.xlane.xlu1 %312 }
  0xaf   : > { %v339_v42 = vmax.f32 %v309_v40, 1e-24  ;;  %v341_v44 = vmax.f32 %v313_v41, 1e-24 }
  0xb1   : > { %664 = vrsqrt.f32 %v339_v42 }
  0xb2   : > { %v317_v45 = vpop.xlane.xlu1 %316  ;;  %666 = vrsqrt.f32 %v340_v43  ;;  %v315_v46 = vpop.xlane.xlu0 %314 }
  0xb3   : > { %668 = vrsqrt.f32 %v341_v44  ;;  %v343_v47 = vmax.f32 %v317_v45, 1e-24  ;;  %v342_v48 = vmax.f32 %v315_v46, 1e-24 }
  0xb5   : > { %670 = vrsqrt.f32 %v343_v47 }
  0xb6   : > { %672 = vrsqrt.f32 %v342_v48  ;;  %v321_v51 = vpop.xlane.xlu1 %320  ;;  %v319_v54 = vpop.xlane.xlu0 %318 }
  0xb7   : > { %v663_v49 = vpop.eup %662  ;;  %v345_v57 = vmax.f32 %v321_v51, 1e-24  ;;  %v344_v59 = vmax.f32 %v319_v54, 1e-24 }
  0xb8   : > { %v370_v52 = vmul.f32 %v663_v49, %v865_v0 }
  0xb9   : > { %674 = vrsqrt.f32 %v345_v57 }
  0xba   : > { %676 = vrsqrt.f32 %v344_v59  ;;  %v325_v62 = vpop.xlane.xlu1 %324  ;;  %v323_v0 = vpop.xlane.xlu0 %322 }
  0xbb   : > { %v665_v50 = vpop.eup %664  ;;  %v347_v4 = vmax.f32 %v325_v62, 1e-24  ;;  %v346_v6 = vmax.f32 %v323_v0, 1e-24 }
  0xbc   : > { %v371_v53 = vmul.f32 %v665_v50, %v871_v2  ;;  %v667_v55 = vpop.eup %666 }
  0xbd   : > { %v669_v58 = vpop.eup %668  ;;  %v372_v60 = vmul.f32 %v667_v55, %v868_v1  ;;  %678 = vrsqrt.f32 %v347_v4 }
  0xbe   : > { %v387_v56 = vpack.c.bf16 %v371_v53, %v370_v52  ;;  %v373_v61 = vmul.f32 %v669_v58, %v878_v5  ;;  %680 = vrsqrt.f32 %v346_v6  ;;  %v329_v1 = vpop.xlane.xlu1 %328  ;;  %v327_v14 = vpop.xlane.xlu0 %326 }
  0xbf   : > { %v671_v63 = vpop.eup %670  ;;  %v349_v18 = vmax.f32 %v329_v1, 1e-24  ;;  %v348_v19 = vmax.f32 %v327_v14, 1e-24 }
  0xc0   : > { %586 = vmatpush3.bf16.xpose.msra.mxu0 %v387_v56  ;;  %v673_v3 = vpop.eup %672  ;;  %v388_v2 = vpack.c.bf16 %v373_v61, %v372_v60  ;;  %v375_v10 = vmul.f32 %v671_v63, %v885_v8 }
  0xc1   : > { %587 = vmatprep.subr.bf16.mxu0 %v776_v35  ;;  %v374_v7 = vmul.f32 %v673_v3, %v888_v9  ;;  %682 = vrsqrt.f32 %v349_v18 }
  0xc2   : > { %684 = vrsqrt.f32 %v348_v19  ;;  %v333_v8 = vpop.xlane.xlu1 %332  ;;  %v331_v27 = vpop.xlane.xlu0 %330 }
  0xc3   : > { %v675_v11 = vpop.eup %674  ;;  %v389_v5 = vpack.c.bf16 %v375_v10, %v374_v7  ;;  %v351_v31 = vmax.f32 %v333_v8, 1e-24  ;;  %v350_v32 = vmax.f32 %v331_v27, 1e-24 }
  0xc4   : > { %v677_v15 = vpop.eup %676  ;;  %v377_v23 = vmul.f32 %v675_v11, %v895_v12 }
  0xc5   : > { %v376_v22 = vmul.f32 %v677_v15, %v898_v13  ;;  %686 = vrsqrt.f32 %v351_v31 }
  0xc6   : > { %688 = vrsqrt.f32 %v350_v32  ;;  %v337_v12 = vpop.xlane.xlu1 %336  ;;  %v335_v38 = vpop.xlane.xlu0 %334 }
  0xc7   : > { %v679_v9 = vpop.eup %678  ;;  %v390_v26 = vpack.c.bf16 %v377_v23, %v376_v22  ;;  %v353_v40 = vmax.f32 %v337_v12, 1e-24  ;;  %v352_v41 = vmax.f32 %v335_v38, 1e-24 }
  0xc8   : > { %588 = vmatpush3.bf16.xpose.msra.mxu0 %v388_v2  ;;  %v681_v30 = vpop.eup %680  ;;  %v379_v36 = vmul.f32 %v679_v9, %v905_v16 }
  0xc9   : > { %589 = vmatprep.subr.bf16.mxu0 %v776_v35  ;;  %v378_v33 = vmul.f32 %v681_v30, %v908_v17  ;;  %690 = vrsqrt.f32 %v353_v40 }
  0xca   : > { %692 = vrsqrt.f32 %v352_v41  ;;  %v286_v16 = vpop.xlane.xlu0 %285 }
  0xcb   : > { %v683_v13 = vpop.eup %682  ;;  %v391_v37 = vpack.c.bf16 %v379_v36, %v378_v33  ;;  %v287_v46 = vmax.f32 %v286_v16, 1e-24 }
  0xcc   : > { %v685_v39 = vpop.eup %684  ;;  %v381_v43 = vmul.f32 %v683_v13, %v915_v20 }
  0xcd   : > { %v380_v42 = vmul.f32 %v685_v39, %v918_v21  ;;  %694 = vrsqrt.f32 %v287_v46 }
  0xcf   : > { %v687_v17 = vpop.eup %686  ;;  %v392_v44 = vpack.c.bf16 %v381_v43, %v380_v42 }
  0xd0   : > { %590 = vmatpush3.bf16.xpose.msra.mxu0 %v389_v5  ;;  %v689_v45 = vpop.eup %688  ;;  %v383_v48 = vmul.f32 %v687_v17, %v926_v24 }
  0xd1   : > { %591 = vmatprep.subr.bf16.mxu0 %v776_v35  ;;  %v382_v47 = vmul.f32 %v689_v45, %v929_v25 }
  0xd3   : > { %v691_v20 = vpop.eup %690  ;;  %v393_v21 = vpack.c.bf16 %v383_v48, %v382_v47 }
  0xd4   : > { %v693_v49 = vpop.eup %692  ;;  %v385_v51 = vmul.f32 %v691_v20, %v942_v28 }
  0xd5   : > { %v384_v50 = vmul.f32 %v693_v49, %v945_v29 }
  0xd7   : > { %v695_v52 = vpop.eup %694  ;;  %v394_v53 = vpack.c.bf16 %v385_v51, %v384_v50 }
  0xd8   : > { %592 = vmatpush3.bf16.xpose.msra.mxu0 %v390_v26  ;;  %v289_v25 = vmul.f32 %v695_v52, %v951_v34 }
  0xd9   : > { %593 = vmatprep.subr.bf16.mxu0 %v776_v35 }
  0xda   : > { %v386_v24 = vpack.c.bf16 %v289_v25, %v289_v25 }
  0xe0   : > { %594 = vmatpush3.bf16.xpose.msra.mxu0 %v391_v37 }
  0xe1   : > { %595 = vmatprep.subr.bf16.mxu0 %v776_v35 }
  0xe8   : > { %596 = vmatpush3.bf16.xpose.msra.mxu0 %v392_v44 }
  0xe9   : > { %597 = vmatprep.subr.bf16.mxu0 %v776_v35 }
  0xf0   : > { %598 = vmatpush3.bf16.xpose.msra.mxu0 %v393_v21 }
  0xf1   : > { %599 = vmatprep.subr.bf16.mxu0 %v776_v35 }
  0xf8   : > { %600 = vmatpush3.bf16.xpose.msra.mxu0 %v394_v53 }
  0xff   : > { %602 = vmatmul.mubr.bf16.vlgmr.msra.gmra.mrb[0].mxu0 %v386_v24 }
 0x1d2   : > { %v429_v54 = vpop.f32.mrb[0].mxu0 }
 0x1d3   : > { %v435_v55 = vmax.f32 %v429_v54, 0.0  ;;  %v603_v29 = vpop.f32.mrb[1].mxu0 }
 0x1d4   : > { %v432_v28 = vpop.f32.mrb[2].mxu0 }
 0x1d5   : > { %436 = vst [vmem:[%s239_s21] sm:$0xff] %v435_v55  ;;  %v604_v34 = vpop.f32.mrb[3].mxu0 }
 0x1d6   : > { %709 = shalt.err (!%p706_p5)
}
 0x1d7   : > { %s710_s6 = scalar_lea.hbm %s986_s28, 128  ;;  %s714_s9 = scalar_lea.hbm %s1036_s3, 256 }
 0x1d8   : > { %p711_p6 = scmp.ne.s32.totalorder %s986_s28, %s710_s6  ;;  %p715_p10 = scmp.lt.u32.totalorder %s986_s28, %s1036_s3 }
 0x1d9   : > { %p716_p11 = scmp.lt.u32.totalorder %s714_s9, %s710_s6  ;;  %p718_p13 = scmp.lt.u32.totalorder %s710_s6, %s986_s28 }
 0x1da   : > { %p712_p7 = pnand %p711_p6, %p839_p4 }
 0x1db   : > { %p717_p12 = por %p716_p11, %p715_p10 }
 0x1dc   : > { %p713_p9 = pneg %p712_p7 }
 0x1dd   : > { %p719_p0 = por %p718_p13, %p717_p12 }
 0x1df   : > { %p720_p1 = pnand %p719_p0, %p713_p9 }
 0x1e1   : > { %723 = shalt.err (!%p720_p1)
}
 0x1e2   : > { %605 = dma.vmem_to_hbm [thread:$0]  (%p839_p4), %s988_s23, 128, %s986_s28, %s438_s29  }
 0x1e3 PF: > { %p611_p2 = scmp.ge.s32.totalorder %s774_s17, 2  ;;  %s465_s18 = sand.u32 1, %s754_s12  }
 0x1e4   : > { %s466_s19 = scalar_lea.sflag [#allocation3], %s465_s18 }
 0x1e5   : > { %p608_p3 = pnand %p611_p2, %p846_p8 }
 0x1e7   : > { %749 = dma.done.wait (!%p608_p3), %s466_s19, 128  }
 0x1e8   : > { %751 = vsyncadd (!%p608_p3), %s466_s19, 4294967168  ;;  %s16_s17 = sadd.s32 1, %s774_s17   ;;  %s1039_s12 = smov %s758_s13 }
 0x1e9   : > { %p13_p5 = scmp.ge.s32.totalorder %s16_s17, 4   ;;  %s1040_s13 = smov %s762_s14 }
 0x1ea   : > { %s1041_s14 = smov %s852_s25  ;;  %s1042_s15 = smov %s770_s16 }
 0x1eb   : > { %s1043_s16 = smov %s1045_s20  ;;  %15 = sbr.rel (!%p13_p5) target bundleno = 4 (0x4), region = 73 }
 0x1f2   :  { %471 = vsyncpa [#allocation3], 1 }
 0x1f3   :  { %473 = vsyncpa [#allocation3 + $0x1], 1 }

</bundles_post_ra>
